<compile_context>
chip_gen: v7x
topology: tpu7x:2x2x1
jax: 0.10.0
libtpu: 0.0.40
codegen_flags: <defaults>
</compile_context>

<pallas_src>
import jax
import jax.numpy as jnp
from jax.experimental import pallas as pl
from jax.experimental.pallas import tpu as pltpu

LN_EPS = 1e-5          # torch.nn.LayerNorm default eps
_ROW_ALIGN = 16        # row-tile granularity (covers bf16 sublane packing too)
_TM_MAX = 1024         # upper bound on the row tile; grid is a serial loop per TC


def _audio_proj_kernel(x_ref, w_ref, g_ref, b_ref, o_ref):
    # x_ref: (tm, K) native dtype   w_ref: (K, N) bf16
    # g_ref/b_ref: (1, N) f32       o_ref: (tm, N)
    # Cast x to bf16 in-kernel (hidden under DMA/MXU), f32 accumulation on the MXU.
    x = x_ref[...].astype(jnp.bfloat16)
    y = jnp.dot(x, w_ref[...], preferred_element_type=jnp.float32)

    # One-pass LayerNorm statistics over the last axis, entirely in f32.
    n_inv = 1.0 / y.shape[-1]
    mean = jnp.sum(y, axis=-1, keepdims=True) * n_inv
    mean_sq = jnp.sum(y * y, axis=-1, keepdims=True) * n_inv
    var = jnp.maximum(mean_sq - mean * mean, 0.0)
    # Fold gamma into the rsqrt scale: out = (y - mean) * (gamma * rsqrt(var+eps)) + beta.
    scale = g_ref[...] * jax.lax.rsqrt(var + LN_EPS)
    o_ref[...] = ((y - mean) * scale + b_ref[...]).astype(o_ref.dtype)


def _round_up(a, b):
    return ((a + b - 1) // b) * b


def _generation():
    try:
        kind = jax.devices()[0].device_kind.lower()
    except Exception:
        return "v6e"
    if "v5 lite" in kind or "v5e" in kind or "v5lite" in kind:
        return "v5e"
    if "v7" in kind:
        return "v7x"
    return "v6e"


# Conservative per-generation VMEM tile budgets (leave headroom under each
# generation's scoped default / physical VMEM) and explicit scoped-VMEM limits.
_VMEM_BUDGET = {"v5e": 14 << 20, "v6e": 26 << 20, "v7x": 22 << 20}
_VMEM_LIMIT = {"v5e": 32 << 20, "v6e": 48 << 20, "v7x": 40 << 20}


def _select_row_tile(M, K, N, in_bytes, out_bytes, gen):
    budget = _VMEM_BUDGET[gen]
    tm = min(_TM_MAX, _round_up(M, _ROW_ALIGN))

    def vmem_usage(t):
        return (2 * t * K * in_bytes       # x row tile, native dtype, double-buffered
                + t * K * 2                # in-kernel bf16 cast of x
                + K * N * 2                # projection weight, bf16, single-buffered
                + 2 * t * N * out_bytes    # output tile, double-buffered
                + 2 * t * N * 4)           # f32 y + LN epilogue temporaries

    while tm > _ROW_ALIGN and vmem_usage(tm) > budget:
        tm //= 2
    tm = max(_ROW_ALIGN, (tm // _ROW_ALIGN) * _ROW_ALIGN)

    if gen == "v7x":
        # 2 TensorCores share the ("parallel",) row axis: keep >= 2 grid steps and
        # an even step count so neither core idles on the tail tile.
        steps = pl.cdiv(M, tm)
        if steps < 2 and M > _ROW_ALIGN:
            tm = max(_ROW_ALIGN, _round_up(pl.cdiv(M, 2), _ROW_ALIGN))
        elif steps > 1 and steps % 2 == 1:
            tm = max(_ROW_ALIGN, _round_up(pl.cdiv(M, steps + 1), _ROW_ALIGN))
    # v5e note: at K,N >~ 512 the kernel is MXU-bound there; large tm (multiple of
    # 128, which the power-of-two selection preserves) keeps the MXU fed.
    return tm


def audio_proj_model(audio_embeds, proj_weight, ln_weight, ln_bias, *,
                     tm=None, out_dtype=None):
    """audio_embeds: (B, S, K); proj_weight: (K, N) (= torch Linear weight.T);
    ln_weight/ln_bias: (N,). Returns (B, S, N)."""
    B, S, K = audio_embeds.shape
    Kw, N = proj_weight.shape
    assert Kw == K, "proj_weight must be (audio_in_dim, cross_attention_dim)"
    M = B * S
    gen = _generation()

    out_dtype = audio_embeds.dtype if out_dtype is None else jnp.dtype(out_dtype)
    in_bytes = jnp.dtype(audio_embeds.dtype).itemsize
    out_bytes = jnp.dtype(out_dtype).itemsize

    if tm is None:
        tm = _select_row_tile(M, K, N, in_bytes, out_bytes, gen)
    grid = (pl.cdiv(M, tm),)  # ragged last block is fine: rows are independent,
                              # out-of-bounds writebacks are dropped by Pallas.

    # No wrapper-side cast/pad of x; weight is pre-cast to bf16 once (constant),
    # LN params stay in f32.
    x = audio_embeds.reshape(M, K)
    w = proj_weight.astype(jnp.bfloat16)
    gamma = ln_weight.astype(jnp.float32).reshape(1, N)
    beta = ln_bias.astype(jnp.float32).reshape(1, N)

    cost = pl.CostEstimate(
        flops=2 * M * K * N,
        transcendentals=M,                                   # one rsqrt per row
        bytes_accessed=M * K * in_bytes + K * N * 2 + M * N * out_bytes + 2 * N * 4,
    )

    const = dict(pipeline_mode=pl.Buffered(1))  # constant-index operands: single-buffered
    out = pl.pallas_call(
        _audio_proj_kernel,
        out_shape=jax.ShapeDtypeStruct((M, N), out_dtype),
        grid_spec=pltpu.PrefetchScalarGridSpec(
            num_scalar_prefetch=0,
            grid=grid,
            in_specs=[
                pl.BlockSpec((tm, K), lambda i: (i, 0)),            # x row tile
                pl.BlockSpec((K, N), lambda i: (0, 0), **const),    # full weight (constant)
                pl.BlockSpec((1, N), lambda i: (0, 0), **const),    # LN gamma (constant)
                pl.BlockSpec((1, N), lambda i: (0, 0), **const),    # LN beta  (constant)
            ],
            out_specs=pl.BlockSpec((tm, N), lambda i: (i, 0)),
        ),
        compiler_params=pltpu.CompilerParams(
            dimension_semantics=("parallel",),
            vmem_limit_bytes=_VMEM_LIMIT[gen],
        ),
        cost_estimate=cost,
    )(x, w, gamma, beta)

    return out.reshape(B, S, N)


def _reference(audio_embeds, proj_weight, ln_weight, ln_bias):
    y = jnp.einsum("bsk,kn->bsn", audio_embeds, proj_weight)
    mean = jnp.mean(y, axis=-1, keepdims=True)
    var = jnp.mean((y - mean) ** 2, axis=-1, keepdims=True)
    y_norm = (y - mean) * jax.lax.rsqrt(var + LN_EPS)
    return y_norm * ln_weight + ln_bias


if __name__ == "__main__":
    # Small shapes consistent with the module (audio_in_dim / cross_attention_dim kept small).
    B, S = 2, 8
    audio_in_dim = 256
    cross_attention_dim = 128

    key = jax.random.PRNGKey(0)
    k_x, k_w, k_g, k_b = jax.random.split(key, 4)

    audio_embeds = jax.random.normal(k_x, (B, S, audio_in_dim), dtype=jnp.float32)
    # proj_weight is (in, out) = torch Linear weight.T, fan-in scaled.
    proj_weight = jax.random.normal(
        k_w, (audio_in_dim, cross_attention_dim), dtype=jnp.float32
    ) * (1.0 / jnp.sqrt(audio_in_dim))
    ln_weight = 1.0 + 0.1 * jax.random.normal(k_g, (cross_attention_dim,), dtype=jnp.float32)
    ln_bias = 0.1 * jax.random.normal(k_b, (cross_attention_dim,), dtype=jnp.float32)

    out = audio_proj_model(audio_embeds, proj_weight, ln_weight, ln_bias)
    out = jax.block_until_ready(out)
    assert out.shape == (B, S, cross_attention_dim)

    # Reference with the same bf16 rounding of the matmul operands the kernel applies.
    ref_q = _reference(
        audio_embeds.astype(jnp.bfloat16).astype(jnp.float32),
        proj_weight.astype(jnp.bfloat16).astype(jnp.float32),
        ln_weight, ln_bias,
    )
    assert jnp.allclose(out, ref_q, atol=1e-2, rtol=1e-2), "kernel mismatch vs bf16-rounded reference"

    # Loose check against the pure-f32 module semantics (bf16 MXU quantization noise only).
    ref_f32 = _reference(audio_embeds, proj_weight, ln_weight, ln_bias)
    assert jnp.allclose(out, ref_f32, atol=7e-2, rtol=7e-2), "kernel drifted from f32 module reference"

    print("KERNEL_OK")
</pallas_src>

<mosaic_0001>
module attributes {stable_mosaic.version = 11 : i64} {
  func.func @_audio_proj_kernel(%arg0: i32, %arg1: memref<16x256xf32, #tpu.memory_space<vmem>>, %arg2: memref<256x128xbf16, #tpu.memory_space<vmem>>, %arg3: memref<1x128xf32, #tpu.memory_space<vmem>>, %arg4: memref<1x128xf32, #tpu.memory_space<vmem>>, %arg5: memref<16x128xf32, #tpu.memory_space<vmem>>) attributes {dimension_semantics = [#tpu.dimension_semantics<parallel>], iteration_bounds = array<i64: 1>, scalar_prefetch = 0 : i64, scratch_operands = 0 : i64, tpu.core_type = #tpu.core_type<tc>, window_params = [{transform_indices = @transform_0, window_bounds = array<i64: 16, 256>}, {pipeline_mode = #tpu.pipeline_mode<synchronous>, transform_indices = @transform_1, window_bounds = array<i64: 256, 128>}, {pipeline_mode = #tpu.pipeline_mode<synchronous>, transform_indices = @transform_2, window_bounds = array<i64: 1, 128>}, {pipeline_mode = #tpu.pipeline_mode<synchronous>, transform_indices = @transform_3, window_bounds = array<i64: 1, 128>}, {transform_indices = @transform_4, window_bounds = array<i64: 16, 128>}]} {
    %c0 = arith.constant 0 : index
    %c0_0 = arith.constant 0 : index
    %0 = vector.load %arg1[%c0, %c0_0] : memref<16x256xf32, #tpu.memory_space<vmem>>, vector<16x256xf32>
    %1 = arith.truncf %0 : vector<16x256xf32> to vector<16x256xbf16>
    %c0_1 = arith.constant 0 : index
    %c0_2 = arith.constant 0 : index
    %2 = vector.load %arg2[%c0_1, %c0_2] : memref<256x128xbf16, #tpu.memory_space<vmem>>, vector<256x128xbf16>
    %cst = arith.constant dense<0.000000e+00> : vector<16x128xf32>
    %3 = tpu.matmul %1, %2, %cst {dimension_numbers = #tpu.dot_dimension_numbers<[1], [0], [0], [1], [0, 0, 1, 1], [], []>} : vector<16x256xbf16>, vector<256x128xbf16>, vector<16x128xf32> -> vector<16x128xf32>
    %cst_3 = arith.constant dense<0.000000e+00> : vector<16xf32>
    %4 = vector.multi_reduction <add>, %3, %cst_3 [1] : vector<16x128xf32> to vector<16xf32>
    %5 = vector.shape_cast %4 : vector<16xf32> to vector<16x1xf32>
    %cst_4 = arith.constant 7.812500e-03 : f32
    %6 = vector.broadcast %cst_4 : f32 to vector<16x1xf32>
    %7 = arith.mulf %5, %6 : vector<16x1xf32>
    %8 = arith.mulf %3, %3 : vector<16x128xf32>
    %cst_5 = arith.constant dense<0.000000e+00> : vector<16xf32>
    %9 = vector.multi_reduction <add>, %8, %cst_5 [1] : vector<16x128xf32> to vector<16xf32>
    %10 = vector.shape_cast %9 : vector<16xf32> to vector<16x1xf32>
    %cst_6 = arith.constant 7.812500e-03 : f32
    %11 = vector.broadcast %cst_6 : f32 to vector<16x1xf32>
    %12 = arith.mulf %10, %11 : vector<16x1xf32>
    %13 = arith.mulf %7, %7 : vector<16x1xf32>
    %14 = arith.subf %12, %13 : vector<16x1xf32>
    %cst_7 = arith.constant 0.000000e+00 : f32
    %15 = vector.broadcast %cst_7 : f32 to vector<16x1xf32>
    %16 = arith.maximumf %14, %15 : vector<16x1xf32>
    %c0_8 = arith.constant 0 : index
    %c0_9 = arith.constant 0 : index
    %17 = vector.load %arg3[%c0_8, %c0_9] : memref<1x128xf32, #tpu.memory_space<vmem>>, vector<1x128xf32>
    %cst_10 = arith.constant 9.99999974E-6 : f32
    %18 = vector.broadcast %cst_10 : f32 to vector<16x1xf32>
    %19 = arith.addf %16, %18 : vector<16x1xf32>
    %20 = math.rsqrt %19 : vector<16x1xf32>
    %21 = vector.broadcast %17 : vector<1x128xf32> to vector<16x128xf32>
    %22 = vector.broadcast %20 : vector<16x1xf32> to vector<16x128xf32>
    %23 = arith.mulf %21, %22 : vector<16x128xf32>
    %24 = vector.broadcast %7 : vector<16x1xf32> to vector<16x128xf32>
    %25 = arith.subf %3, %24 : vector<16x128xf32>
    %26 = arith.mulf %25, %23 : vector<16x128xf32>
    %c0_11 = arith.constant 0 : index
    %c0_12 = arith.constant 0 : index
    %27 = vector.load %arg4[%c0_11, %c0_12] : memref<1x128xf32, #tpu.memory_space<vmem>>, vector<1x128xf32>
    %28 = vector.broadcast %27 : vector<1x128xf32> to vector<16x128xf32>
    %29 = arith.addf %26, %28 : vector<16x128xf32>
    %c0_13 = arith.constant 0 : index
    %c0_14 = arith.constant 0 : index
    %30 = vector.load %arg5[%c0_13, %c0_14] : memref<16x128xf32, #tpu.memory_space<vmem>>, vector<16x128xf32>
    tpu.vector_store %arg5[%c0_13, %c0_14], %29 {strides = array<i32>} : memref<16x128xf32, #tpu.memory_space<vmem>>, vector<16x128xf32>,
    return
  }
  func.func @transform_0(%arg0: i32) -> (i32, i32) {
    %c0_i32 = arith.constant 0 : i32
    %c0_i32_0 = arith.constant 0 : i32
    return %arg0, %c0_i32 : i32, i32
  }
  func.func @transform_1(%arg0: i32) -> (i32, i32) {
    %c0_i32 = arith.constant 0 : i32
    %c0_i32_0 = arith.constant 0 : i32
    %c0_i32_1 = arith.constant 0 : i32
    return %c0_i32, %c0_i32_0 : i32, i32
  }
  func.func @transform_2(%arg0: i32) -> (i32, i32) {
    %c0_i32 = arith.constant 0 : i32
    %c0_i32_0 = arith.constant 0 : i32
    %c0_i32_1 = arith.constant 0 : i32
    return %c0_i32, %c0_i32_0 : i32, i32
  }
  func.func @transform_3(%arg0: i32) -> (i32, i32) {
    %c0_i32 = arith.constant 0 : i32
    %c0_i32_0 = arith.constant 0 : i32
    %c0_i32_1 = arith.constant 0 : i32
    return %c0_i32, %c0_i32_0 : i32, i32
  }
  func.func @transform_4(%arg0: i32) -> (i32, i32) {
    %c0_i32 = arith.constant 0 : i32
    %c0_i32_0 = arith.constant 0 : i32
    return %arg0, %c0_i32 : i32, i32
  }
}

</mosaic_0001>

<bundles_post_ra>
// kernel: tpu_custom_call.1
= control target key start
LH: loop header
LB: loop body
LE: loop exit
PB: predicated region body
PF: predicated region fallthrough
CT: control target
= control target key end

     0   :  { %9 = vsyncpa [#allocation3], 0  ;;  %s505_s0 = inlined_call_operand.hbm [shape: f32[16,256], index: 0, kind: input, shape index: {}]   ;;  %s506_s1 = inlined_call_operand.hbm [shape: bf16[256,128], index: 1, kind: input, shape index: {}]   ;;  %s507_s2 = inlined_call_operand.vmem [shape: f32[1,128], index: 2, kind: input, shape index: {}]   ;;  %s508_s3 = inlined_call_operand.vmem [shape: f32[1,128], index: 3, kind: input, shape index: {}]   ;;  %s509_s4 = inlined_call_operand.hbm [shape: f32[16,128], index: 4, kind: output, shape index: {}]  }
   0x1   :  { %10 = vsyncpa [#allocation6], 0 }
   0x2   :  { %11 = vsyncpa [#allocation4], 0  ;;  %s429_s15 = smov [#allocation2]   ;;  %s357_s19 = scalar_lea.hbm %s505_s0, 512 }
   0x3   :  { %s17_s16 = sshll.u32 %s429_s15, 4  ;;  %p358_p0 = scmp.ne.s32.totalorder %s505_s0, %s357_s19  ;;  %s18_s16 = int_to_ptr.vmem [resolvable:$true] %s17_s16 }
   0x4   :  { %p361_p1 = scmp.lt.u32.totalorder %s357_s19, %s505_s0 }
   0x6   :  { %p363_p2 = pnand %p361_p1, %p358_p0 }
   0x8   :  { %366 = shalt.err (!%p363_p2)
}
   0x9   :  { %s367_s24 = scalar_lea.vmem %s18_s16, 512  ;;  %p372_p4 = scmp.lt.s32.totalorder %s18_s16, %s18_s16 }
   0xa   :  { %p368_p3 = scmp.ne.s32.totalorder %s18_s16, %s367_s24  ;;  %p373_p5 = scmp.lt.s32.totalorder %s367_s24, %s367_s24 }
   0xc   :  { %p374_p6 = por %p373_p5, %p372_p4 }
   0xe   :  { %p375_p7 = pnand %p374_p6, %p368_p3 }
  0x10   :  { %378 = shalt.err (!%p375_p7)
}
  0x11   :  { %s430_s25 = smov 256   ;;  %s431_s26 = smov 16  }
  0x12   :  { %23 = dma.hbm_to_vmem [thread:$0]  %s505_s0, 512, %s18_s16, [#allocation3], %s430_s25, %s430_s25, %s431_s26  }
  0x13   :  { %s432_s29 = smov [#allocation5]   ;;  %s379_s7 = scalar_lea.hbm %s506_s1, 2048 }
  0x14   :  { %s29_s30 = sshll.u32 %s432_s29, 4  ;;  %p380_p8 = scmp.ne.s32.totalorder %s506_s1, %s379_s7  ;;  %s30_s30 = int_to_ptr.vmem [resolvable:$true] %s29_s30 }
  0x15   :  { %p383_p9 = scmp.lt.u32.totalorder %s379_s7, %s506_s1 }
  0x17   :  { %p385_p10 = pnand %p383_p9, %p380_p8 }
  0x19   :  { %388 = shalt.err (!%p385_p10)
}
  0x1a   :  { %s389_s12 = scalar_lea.vmem %s30_s30, 2048  ;;  %p394_p12 = scmp.lt.s32.totalorder %s30_s30, %s30_s30 }
  0x1b   :  { %p390_p11 = scmp.ne.s32.totalorder %s30_s30, %s389_s12  ;;  %p395_p13 = scmp.lt.s32.totalorder %s389_s12, %s389_s12 }
  0x1d   :  { %p396_p0 = por %p395_p13, %p394_p12 }
  0x1f   :  { %p397_p1 = pnand %p396_p0, %p390_p11 }
  0x21   :  { %400 = shalt.err (!%p397_p1)
}
  0x22   :  { %s433_s0 = smov 64   ;;  %s434_s13 = smov 4  }
  0x23   :  { %35 = dma.hbm_to_vmem [thread:$0]  %s506_s1, 2048, %s30_s30, [#allocation6], %s433_s0, %s433_s0, %s434_s13  }
  0x24   :  { %423 = dma.done.wait [#allocation3], 512  }
  0x25   :  { %424 = vsyncadd [#allocation3], 4294966784 }
  0x26   :  { %425 = dma.done.wait [#allocation6], 2048  }
  0x27   :  { %426 = vsyncadd [#allocation6], 4294965248  ;;  %v337_v0 = vld [vmem:[#allocation5 + $0x40] sm:$0xff]   ;;  %v339_v2 = vld [vmem:[#allocation5 + $0x48] sm:$0xff]   ;;  %s435_s19 = smov [#allocation7]  }
  0x28   :  { %v338_v1 = vld [vmem:[#allocation5] sm:$0xff]   ;;  %306 = vmatprep.subr.bf16.mxu0 %v337_v0  ;;  %v340_v3 = vld [vmem:[#allocation5 + $0x8] sm:$0xff]   ;;  %v341_v4 = vld [vmem:[#allocation5 + $0x50] sm:$0xff]   ;;  %s275_s20 = sshll.u32 %s435_s19, 4  ;;  %s276_s20 = int_to_ptr.vmem [resolvable:$true] %s275_s20 }
  0x29   :  { %307 = vmatpush3.bf16.msra.mxu0 %v338_v1  ;;  %v342_v5 = vld [vmem:[#allocation5 + $0x10] sm:$0xff]   ;;  %v343_v6 = vld [vmem:[#allocation5 + $0x58] sm:$0xff]   ;;  %v345_v8 = vld [vmem:[#allocation5 + $0x60] sm:$0xff]   ;;  %p406_p3 = scmp.lt.s32.totalorder %s276_s20, %s276_s20 }
  0x2a   :  { %308 = vmatprep.subr.bf16.mxu0 %v339_v2  ;;  %v344_v7 = vld [vmem:[#allocation5 + $0x18] sm:$0xff]   ;;  %v346_v9 = vld [vmem:[#allocation5 + $0x20] sm:$0xff]   ;;  %v347_v10 = vld [vmem:[#allocation5 + $0x68] sm:$0xff]  }
  0x2b   :  { %v48_v11 = vld [vmem:[#allocation2 + $0x8] sm:$0xff]  ;;  %v50_v12 = vld [vmem:[#allocation2 + $0x18] sm:$0xff]  ;;  %v349_v15 = vld [vmem:[#allocation5 + $0x70] sm:$0xff]  }
  0x2c   :  { %v52_v13 = vpack.c.bf16 %v50_v12, %v48_v11  ;;  %v348_v14 = vld [vmem:[#allocation5 + $0x28] sm:$0xff]   ;;  %v350_v16 = vld [vmem:[#allocation5 + $0x30] sm:$0xff]   ;;  %v351_v17 = vld [vmem:[#allocation5 + $0x78] sm:$0xff]  }
  0x2d   :  { %309 = vmatpush3.bf16.msra.mxu0 %v340_v3  ;;  %v352_v18 = vld [vmem:[#allocation5 + $0x38] sm:$0xff]   ;;  %v47_v19 = vld [vmem:[#allocation2] sm:$0xff]  ;;  %v49_v20 = vld [vmem:[#allocation2 + $0x10] sm:$0xff] }
  0x2e   :  { %310 = vmatprep.subr.bf16.mxu0 %v341_v4  ;;  %213 = vmatprep.mubr.bf16.mxu0 %v52_v13  ;;  %v51_v21 = vpack.c.bf16 %v49_v20, %v47_v19  ;;  %v304_v46 = vld [vmem:[%s507_s2] ss:$0 sm:$0xff]  ;;  %s401_s2 = scalar_lea.vmem %s276_s20, 256 }
  0x2f   :  { %v305_v50 = vld [vmem:[%s508_s3] ss:$0 sm:$0xff]  ;;  %p402_p2 = scmp.ne.s32.totalorder %s276_s20, %s401_s2  ;;  %p407_p4 = scmp.lt.s32.totalorder %s401_s2, %s401_s2 }
  0x31   :  { %311 = vmatpush3.bf16.msra.mxu0 %v342_v5  ;;  %p408_p5 = por %p407_p4, %p406_p3 }
  0x32   :  { %312 = vmatprep.subr.bf16.mxu0 %v343_v6 }
  0x33   :  { %p409_p6 = pnand %p408_p5, %p402_p2 }
  0x35   :  { %313 = vmatpush3.bf16.msra.mxu0 %v344_v7 }
  0x36   :  { %314 = vmatprep.subr.bf16.mxu0 %v345_v8 }
  0x39   :  { %315 = vmatpush3.bf16.msra.mxu0 %v346_v9 }
  0x3a   :  { %316 = vmatprep.subr.bf16.mxu0 %v347_v10 }
  0x3d   :  { %317 = vmatpush3.bf16.msra.mxu0 %v348_v14 }
  0x3e   :  { %318 = vmatprep.subr.bf16.mxu0 %v349_v15 }
  0x41   :  { %319 = vmatpush3.bf16.msra.mxu0 %v350_v16 }
  0x42   :  { %320 = vmatprep.subr.bf16.mxu0 %v351_v17 }
  0x45   :  { %321 = vmatpush3.bf16.msra.mxu0 %v352_v18 }
  0x48   :  { %214 = vmatmul.mubr.bf16.vlgmr.msra.gmra.mrb[0].mxu0 %v51_v21 }
 0x11b   :  { %v322_v22 = vpop.f32.mrb[0].mxu0 }
 0x11c   :  { %v323_v23 = vpop.f32.mrb[1].mxu0 }
 0x11d   :  { %v324_v24 = vadd.f32 %v323_v23, %v322_v22  ;;  %v325_v25 = vpop.f32.mrb[2].mxu0 }
 0x11e   :  { %v326_v26 = vpop.f32.mrb[3].mxu0 }
 0x11f   :  { %v327_v27 = vadd.f32 %v326_v26, %v325_v25  ;;  %222 = vadd.xlane.f32.xlu0 %v324_v24  ;;  %v228_v28 = vmul.f32 %v324_v24, %v324_v24 }
 0x121   :  { %230 = vadd.xlane.f32.xlu1 %v228_v28  ;;  %v229_v29 = vmul.f32 %v327_v27, %v327_v27 }
 0x123   :  { %224 = vadd.xlane.f32.xlu0 %v327_v27 }
 0x125   :  { %232 = vadd.xlane.f32.xlu1 %v229_v29 }
 0x1ac   :  { %v223_v30 = vpop.xlane.xlu0 %222 }
 0x1ad   :  { %v226_v31 = vmul.f32 0.0078125, %v223_v30 }
 0x1ae   :  { %v231_v32 = vpop.xlane.xlu1 %230 }
 0x1af   :  { %v236_v33 = vmul.f32 %v226_v31, %v226_v31  ;;  %v234_v34 = vmul.f32 0.0078125, %v231_v32  ;;  %v255_v48 = vsub.f32 %v324_v24, %v226_v31 }
 0x1b0   :  { %v225_v35 = vpop.xlane.xlu0 %224 }
 0x1b1   :  { %v238_v36 = vsub.f32 %v234_v34, %v236_v33  ;;  %v227_v37 = vmul.f32 0.0078125, %v225_v35 }
 0x1b2   :  { %v233_v38 = vpop.xlane.xlu1 %232 }
 0x1b3   :  { %v240_v39 = vmax.f32 %v238_v36, 0.0  ;;  %v237_v40 = vmul.f32 %v227_v37, %v227_v37  ;;  %v235_v41 = vmul.f32 0.0078125, %v233_v38  ;;  %v256_v53 = vsub.f32 %v327_v27, %v227_v37 }
 0x1b5   :  { %v243_v42 = vadd.f32 1e-05, %v240_v39  ;;  %v239_v43 = vsub.f32 %v235_v41, %v237_v40 }
 0x1b7   :  { %353 = vrsqrt.f32 %v243_v42  ;;  %v241_v44 = vmax.f32 %v239_v43, 0.0 }
 0x1b9   :  { %v244_v45 = vadd.f32 1e-05, %v241_v44 }
 0x1bb   :  { %355 = vrsqrt.f32 %v244_v45 }
 0x1c1   :  { %v354_v47 = vpop.eup %353 }
 0x1c2   :  { %v253_v49 = vmul.f32 %v354_v47, %v304_v46 }
 0x1c4   :  { %v257_v51 = vmul.f32 %v255_v48, %v253_v49 }
 0x1c5   :  { %v356_v52 = vpop.eup %355 }
 0x1c6   :  { %v254_v54 = vmul.f32 %v356_v52, %v304_v46  ;;  %v266_v55 = vadd.f32 %v305_v50, %v257_v51 }
 0x1c8   :  { %v258_v56 = vmul.f32 %v256_v53, %v254_v54  ;;  %268 = vst [vmem:[#allocation7] sm:$0xff] %v266_v55 }
 0x1ca   :  { %v267_v57 = vadd.f32 %v305_v50, %v258_v56 }
 0x1cc   :  { %269 = vst [vmem:[#allocation7 + $0x8] sm:$0xff] %v267_v57 }
 0x1cd   :  { %412 = shalt.err (!%p409_p6)
}
 0x1ce   :  { %s413_s22 = scalar_lea.hbm %s509_s4, 256 }
 0x1cf   :  { %p414_p7 = scmp.ne.s32.totalorder %s509_s4, %s413_s22  ;;  %p417_p8 = scmp.lt.u32.totalorder %s413_s22, %s509_s4 }
 0x1d1   :  { %p419_p9 = pnand %p417_p8, %p414_p7 }
 0x1d3   :  { %422 = shalt.err (!%p419_p9)
}
 0x1d4   :  { %s436_s27 = smov 128   ;;  %s437_s28 = smov 8  }
 0x1d5   :  { %281 = dma.vmem_to_hbm [thread:$0]  %s276_s20, 256, %s509_s4, [#allocation4], %s436_s27, %s436_s27, %s437_s28  }
 0x1d6   :  { %427 = dma.done.wait [#allocation4], 256  }
 0x1d7   :  { %428 = vsyncadd [#allocation4], 4294967040 }
 0x1d8   :  { %285 = vsyncpa [#allocation3], 1 }
 0x1d9   :  { %286 = vsyncpa [#allocation6], 1 }
 0x1da   :  { %287 = vsyncpa [#allocation4], 1 }

</bundles_post_ra>
